<compile_context>
chip_gen: v6e
topology: v6e:2x2x1
jax: 0.10.0
libtpu: 0.0.40
codegen_flags: <defaults>
</compile_context>

<pallas_src>
import functools
import math

import jax
import jax.numpy as jnp
from jax.experimental import pallas as pl
from jax.experimental.pallas import tpu as pltpu

# ------------------- config (ProGen3-like, scaled down) -------------------
BATCH = 2
SEQ = 16
HIDDEN = 64
NUM_HEADS = 4
NUM_KV_HEADS = 2                      # GQA: 2 query heads share each kv head
HEAD_DIM = HIDDEN // NUM_HEADS        # 16
MAX_POS = 32
ROPE_THETA = 10000.0
CLIP_QKV = 8.0

Q_WIDTH = NUM_HEADS * HEAD_DIM                     # 64
KV_WIDTH = NUM_KV_HEADS * HEAD_DIM                 # 32
QKV_WIDTH = Q_WIDTH + 2 * KV_WIDTH                 # 128 (lane-dense fused QKV)
NEG_BIG = -1e30                                    # finite mask constant (no -inf)


# ------------------------------ fused kernel ------------------------------
def _fused_attn_kernel(x_ref, wqkv_ref, wo_ref, cos_ref, sin_ref, o_ref, attn_slab,
                       *, num_heads, num_kv_heads, head_dim, scale, clip):
    """One batch element: x -> QKV proj -> clip -> RoPE -> causal GQA attn -> O proj."""
    S = x_ref.shape[0]
    D = head_dim
    half = D // 2
    Hq = num_heads
    Hkv = num_kv_heads
    groups = Hq // Hkv
    qw = Hq * D
    kw = Hkv * D

    # ---- fused QKV projection: single lane-dense (S, 128) bf16 MXU matmul ----
    x = x_ref[...].astype(jnp.bfloat16)
    qkv = jnp.dot(x, wqkv_ref[...], preferred_element_type=jnp.float32)   # (S,128) f32

    # clip_qkv applied jointly to q, k, v (before RoPE, as in torch)
    if clip is not None:
        qkv = jnp.clip(qkv, -clip, clip)

    q = qkv[:, :qw]                    # (S, Hq*D)
    k = qkv[:, qw:qw + kw]             # (S, Hkv*D)
    v = qkv[:, qw + kw:]               # (S, Hkv*D)

    # RoPE tables (host-prepared, per-head-adjacent layout, tiled to Hq*D lanes):
    #   cos: per head block [ cos(angles) | cos(angles) ]
    #   sin: per head block [ -sin(angles) | sin(angles) ]   (rotate_half sign folded)
    cos_q = cos_ref[...]               # (S, Hq*D) f32
    sin_q = sin_ref[...]               # (S, Hq*D) f32
    cos_k = cos_q[:, :kw]              # first Hkv head blocks reuse the same table
    sin_k = sin_q[:, :kw]

    def rope(t, cos_t, sin_t):
        # Wide-vreg RoPE on the whole slab.  The "swap halves within each head"
        # permutation is two XLU lane rotates + one select (no per-head slices).
        W = t.shape[1]
        lane = jax.lax.broadcasted_iota(jnp.int32, t.shape, 1)
        first_half = (lane % D) < half
        swapped = jnp.where(first_half,
                            pltpu.roll(t, shift=W - half, axis=1),   # -> t[col + half]
                            pltpu.roll(t, shift=half, axis=1))       # -> t[col - half]
        return t * cos_t + swapped * sin_t

    # Pre-scale q (S*Hq*D multiplies) instead of scaling every (S, S) score matrix.
    q_rot = rope(q, cos_q, sin_q) * scale        # (S, Hq*D) f32
    k_rot = rope(k, cos_k, sin_k)                # (S, Hkv*D) f32

    # Additive causal bias for the group-stacked (groups*S, S) score layout,
    # built once and shared by every KV group.  Finite (not -inf) so a future
    # fully-masked row (KV cache / padding) cannot produce NaN.
    row = jax.lax.broadcasted_iota(jnp.int32, (groups * S, S), 0)
    col = jax.lax.broadcasted_iota(jnp.int32, (groups * S, S), 1)
    bias = jnp.where(col <= row % S, 0.0, NEG_BIG).astype(jnp.float32)

    contract = (((1,), (1,)), ((), ()))          # q @ k^T over head_dim

    for g in range(Hkv):
        k_g = k_rot[:, g * D:(g + 1) * D]        # (S, D) -- rotated once per KV head
        v_g = v[:, g * D:(g + 1) * D]            # (S, D)

        # Stack this KV head's `groups` query heads along rows: one K=D QK^T,
        # one masked softmax and one P@V cover the whole group.
        q_g = jnp.concatenate(
            [q_rot[:, (g * groups + r) * D:(g * groups + r + 1) * D]
             for r in range(groups)], axis=0)    # (groups*S, D)

        s = jax.lax.dot_general(q_g, k_g, contract,
                                preferred_element_type=jnp.float32) + bias
        m = jnp.max(s, axis=-1, keepdims=True)
        p = jnp.exp(s - m)                       # masked cols underflow to exactly 0
        l = jnp.sum(p, axis=-1, keepdims=True)
        o_g = jnp.dot(p, v_g, preferred_element_type=jnp.float32)    # (groups*S, D)
        o_g = o_g / l                            # exact reciprocal (accuracy)

        # Scatter each head's rows into the (S, Hq*D) slab at its lane offset
        # (head-major == torch transpose(1,2).reshape); bounds live ranges and
        # makes the O-projection input lane-dense.
        for r in range(groups):
            h = g * groups + r
            attn_slab[:, h * D:(h + 1) * D] = o_g[r * S:(r + 1) * S, :]

    # output projection (bf16 MXU operands, f32 accumulation), same kernel
    out = jnp.dot(attn_slab[...].astype(jnp.bfloat16), wo_ref[...],
                  preferred_element_type=jnp.float32)
    o_ref[...] = out.astype(o_ref.dtype)


def attention_forward(x, position_ids, params):
    """x: (B, S, HIDDEN), position_ids: (B, S) int32 -> (B, S, HIDDEN)."""
    B, S, H = x.shape

    # RoPE tables gathered by position_ids (host-side glue; rotation is in-kernel)
    cos = params["cos_wide"][position_ids]          # (B, S, Hq*D)
    sin = params["sin_wide_signed"][position_ids]   # (B, S, Hq*D)

    kernel = functools.partial(
        _fused_attn_kernel,
        num_heads=NUM_HEADS, num_kv_heads=NUM_KV_HEADS, head_dim=HEAD_DIM,
        scale=1.0 / math.sqrt(HEAD_DIM), clip=CLIP_QKV)

    return pl.pallas_call(
        kernel,
        out_shape=jax.ShapeDtypeStruct((B, S, H), x.dtype),
        grid=(B,),
        in_specs=[
            pl.BlockSpec((pl.Squeezed(), S, H), lambda b: (b, 0, 0)),
            pl.BlockSpec((H, QKV_WIDTH), lambda b: (0, 0)),
            pl.BlockSpec((Q_WIDTH, H), lambda b: (0, 0)),
            pl.BlockSpec((pl.Squeezed(), S, Q_WIDTH), lambda b: (b, 0, 0)),
            pl.BlockSpec((pl.Squeezed(), S, Q_WIDTH), lambda b: (b, 0, 0)),
        ],
        out_specs=pl.BlockSpec((pl.Squeezed(), S, H), lambda b: (b, 0, 0)),
        scratch_shapes=[pltpu.VMEM((S, Q_WIDTH), jnp.float32)],
        compiler_params=pltpu.CompilerParams(
            dimension_semantics=("parallel",)),
    )(x, params["wqkv_t"], params["wo_t"], cos, sin)


# ------------------------------ params ------------------------------
def init_params(key):
    ks = jax.random.split(key, 4)

    def lin_w(k, out_f, in_f):  # nn.Linear default init (uniform +/- 1/sqrt(fan_in))
        bound = 1.0 / math.sqrt(in_f)
        w = jax.random.uniform(k, (out_f, in_f), jnp.float32, -bound, bound)
        # Parameters are stored in bf16 (DMA/VMEM win at real sizes); keep an
        # identical-valued f32 copy so the pure-JAX reference sees the same weights.
        return w.astype(jnp.bfloat16)

    wq = lin_w(ks[0], NUM_HEADS * HEAD_DIM, HIDDEN)
    wk = lin_w(ks[1], NUM_KV_HEADS * HEAD_DIM, HIDDEN)
    wv = lin_w(ks[2], NUM_KV_HEADS * HEAD_DIM, HIDDEN)
    wo = lin_w(ks[3], HIDDEN, NUM_HEADS * HEAD_DIM)

    inv_freq = ROPE_THETA ** (-(jnp.arange(0, HEAD_DIM, 2, dtype=jnp.float32) / HEAD_DIM))
    t = jnp.arange(MAX_POS, dtype=jnp.float32)
    angles_half = jnp.outer(t, inv_freq)                     # (MAX_POS, D/2)
    angles_full = jnp.concatenate([angles_half, angles_half], axis=1)
    cos_half = jnp.cos(angles_half)
    sin_half = jnp.sin(angles_half)

    # Kernel RoPE tables: per-head-adjacent layout, rotate_half sign folded into sin,
    # tiled over heads so the kernel applies RoPE on whole wide lane slabs.
    cos_head = jnp.concatenate([cos_half, cos_half], axis=1)           # (MAX_POS, D)
    sin_head = jnp.concatenate([-sin_half, sin_half], axis=1)          # (MAX_POS, D)
    cos_wide = jnp.tile(cos_head, (1, NUM_HEADS))                      # (MAX_POS, Hq*D)
    sin_wide = jnp.tile(sin_head, (1, NUM_HEADS))

    return dict(
        # f32 copies of the (bf16-valued) weights for the pure-JAX reference
        wq_t=wq.astype(jnp.float32).T, wk_t=wk.astype(jnp.float32).T,
        wv_t=wv.astype(jnp.float32).T, wo_t_ref=wo.astype(jnp.float32).T,
        # fused, bf16 kernel weights: (HIDDEN, Hq*D + 2*Hkv*D) = (64, 128)
        wqkv_t=jnp.concatenate([wq.T, wk.T, wv.T], axis=1),
        wo_t=wo.T,
        # kernel RoPE tables (f32 -- keep rotary math full precision)
        cos_wide=cos_wide, sin_wide_signed=sin_wide,
        # reference RoPE tables
        cos_cached=jnp.cos(angles_full), sin_cached=jnp.sin(angles_full),
    )


# ------------------------------ pure-JAX reference ------------------------------
def reference_forward(x, position_ids, params):
    B, S, H = x.shape
    q = (x @ params["wq_t"]).reshape(B, S, NUM_HEADS, HEAD_DIM)
    k = (x @ params["wk_t"]).reshape(B, S, NUM_KV_HEADS, HEAD_DIM)
    v = (x @ params["wv_t"]).reshape(B, S, NUM_KV_HEADS, HEAD_DIM)
    q = jnp.clip(q, -CLIP_QKV, CLIP_QKV)
    k = jnp.clip(k, -CLIP_QKV, CLIP_QKV)
    v = jnp.clip(v, -CLIP_QKV, CLIP_QKV)
    cos = params["cos_cached"][position_ids][:, :, None, :]
    sin = params["sin_cached"][position_ids][:, :, None, :]

    def rot(t):
        t1, t2 = t[..., : HEAD_DIM // 2], t[..., HEAD_DIM // 2:]
        return jnp.concatenate([-t2, t1], axis=-1)

    q = q * cos + rot(q) * sin
    k = k * cos + rot(k) * sin
    q = jnp.transpose(q, (0, 2, 1, 3))
    k = jnp.transpose(k, (0, 2, 1, 3))
    v = jnp.transpose(v, (0, 2, 1, 3))
    groups = NUM_HEADS // NUM_KV_HEADS
    k = jnp.repeat(k, groups, axis=1)
    v = jnp.repeat(v, groups, axis=1)
    s = jnp.einsum("bhqd,bhkd->bhqk", q, k) / math.sqrt(HEAD_DIM)
    mask = jnp.tril(jnp.ones((S, S), dtype=bool))
    s = jnp.where(mask, s, -jnp.inf)
    p = jax.nn.softmax(s, axis=-1)
    o = jnp.einsum("bhqk,bhkd->bhqd", p, v)
    o = jnp.transpose(o, (0, 2, 1, 3)).reshape(B, S, HIDDEN)
    return o @ params["wo_t_ref"]


if __name__ == "__main__":
    key = jax.random.PRNGKey(0)
    k_x, k_p = jax.random.split(key)
    x = jax.random.normal(k_x, (BATCH, SEQ, HIDDEN), jnp.float32)
    position_ids = jnp.broadcast_to(jnp.arange(SEQ, dtype=jnp.int32), (BATCH, SEQ))
    params = init_params(k_p)

    out = attention_forward(x, position_ids, params)
    out = jax.block_until_ready(out)

    ref = reference_forward(x, position_ids, params)
    assert out.shape == (BATCH, SEQ, HIDDEN)
    err = float(jnp.max(jnp.abs(out - ref)))
    # bf16 MXU operands for the projections -> small drift vs the f32 reference
    assert jnp.allclose(out, ref, atol=3e-2, rtol=3e-2), f"max abs err {err}"
    print("KERNEL_OK")
</pallas_src>

<mosaic_0001>
module attributes {stable_mosaic.version = 11 : i64} {
  func.func @_fused_attn_kernel(%arg0: i32, %arg1: memref<1x16x64xf32, #tpu.memory_space<vmem>>, %arg2: memref<64x128xbf16, #tpu.memory_space<vmem>>, %arg3: memref<64x64xbf16, #tpu.memory_space<vmem>>, %arg4: memref<1x16x64xf32, #tpu.memory_space<vmem>>, %arg5: memref<1x16x64xf32, #tpu.memory_space<vmem>>, %arg6: memref<1x16x64xf32, #tpu.memory_space<vmem>>, %arg7: memref<16x64xf32, #tpu.memory_space<vmem>>) attributes {dimension_semantics = [#tpu.dimension_semantics<parallel>], iteration_bounds = array<i64: 2>, scalar_prefetch = 0 : i64, scratch_operands = 1 : i64, tpu.core_type = #tpu.core_type<tc>, window_params = [{transform_indices = @transform_0, window_bounds = array<i64: 1, 16, 64>}, {pipeline_mode = #tpu.pipeline_mode<synchronous>, transform_indices = @transform_1, window_bounds = array<i64: 64, 128>}, {pipeline_mode = #tpu.pipeline_mode<synchronous>, transform_indices = @transform_2, window_bounds = array<i64: 64, 64>}, {transform_indices = @transform_3, window_bounds = array<i64: 1, 16, 64>}, {transform_indices = @transform_4, window_bounds = array<i64: 1, 16, 64>}, {transform_indices = @transform_5, window_bounds = array<i64: 1, 16, 64>}]} {
    %c0 = arith.constant 0 : index
    %c0_0 = arith.constant 0 : index
    %c0_1 = arith.constant 0 : index
    %0 = vector.load %arg1[%c0, %c0_0, %c0_1] : memref<1x16x64xf32, #tpu.memory_space<vmem>>, vector<1x16x64xf32>
    %1 = vector.shape_cast %0 : vector<1x16x64xf32> to vector<16x64xf32>
    %2 = arith.truncf %1 : vector<16x64xf32> to vector<16x64xbf16>
    %c0_2 = arith.constant 0 : index
    %c0_3 = arith.constant 0 : index
    %3 = vector.load %arg2[%c0_2, %c0_3] : memref<64x128xbf16, #tpu.memory_space<vmem>>, vector<64x128xbf16>
    %cst = arith.constant dense<0.000000e+00> : vector<16x128xf32>
    %4 = tpu.matmul %2, %3, %cst {dimension_numbers = #tpu.dot_dimension_numbers<[1], [0], [0], [1], [0, 0, 1, 1], [], []>} : vector<16x64xbf16>, vector<64x128xbf16>, vector<16x128xf32> -> vector<16x128xf32>
    %cst_4 = arith.constant -8.000000e+00 : f32
    %cst_5 = arith.constant 8.000000e+00 : f32
    %5 = vector.broadcast %cst_4 : f32 to vector<16x128xf32>
    %6 = arith.maximumf %5, %4 : vector<16x128xf32>
    %7 = vector.broadcast %cst_5 : f32 to vector<16x128xf32>
    %8 = arith.minimumf %7, %6 : vector<16x128xf32>
    %9 = vector.extract_strided_slice %8 {offsets = [0, 0], sizes = [16, 64], strides = [1, 1]} : vector<16x128xf32> to vector<16x64xf32>
    %10 = vector.extract_strided_slice %8 {offsets = [0, 64], sizes = [16, 32], strides = [1, 1]} : vector<16x128xf32> to vector<16x32xf32>
    %11 = vector.extract_strided_slice %8 {offsets = [0, 96], sizes = [16, 32], strides = [1, 1]} : vector<16x128xf32> to vector<16x32xf32>
    %c0_6 = arith.constant 0 : index
    %c0_7 = arith.constant 0 : index
    %c0_8 = arith.constant 0 : index
    %12 = vector.load %arg4[%c0_6, %c0_7, %c0_8] : memref<1x16x64xf32, #tpu.memory_space<vmem>>, vector<1x16x64xf32>
    %13 = vector.shape_cast %12 : vector<1x16x64xf32> to vector<16x64xf32>
    %c0_9 = arith.constant 0 : index
    %c0_10 = arith.constant 0 : index
    %c0_11 = arith.constant 0 : index
    %14 = vector.load %arg5[%c0_9, %c0_10, %c0_11] : memref<1x16x64xf32, #tpu.memory_space<vmem>>, vector<1x16x64xf32>
    %15 = vector.shape_cast %14 : vector<1x16x64xf32> to vector<16x64xf32>
    %16 = vector.extract_strided_slice %13 {offsets = [0, 0], sizes = [16, 32], strides = [1, 1]} : vector<16x64xf32> to vector<16x32xf32>
    %17 = vector.extract_strided_slice %15 {offsets = [0, 0], sizes = [16, 32], strides = [1, 1]} : vector<16x64xf32> to vector<16x32xf32>
    %18 = tpu.iota {dimensions = array<i32: 1>} : vector<16x64xi32>
    %c16_i32 = arith.constant 16 : i32
    %c0_i32 = arith.constant 0 : i32
    %19 = arith.cmpi eq, %c16_i32, %c0_i32 : i32
    %c1_i32 = arith.constant 1 : i32
    %20 = arith.select %19, %c1_i32, %c16_i32 : i32
    %21 = vector.broadcast %20 : i32 to vector<16x64xi32>
    %22 = arith.remsi %18, %21 : vector<16x64xi32>
    %c0_i32_12 = arith.constant 0 : i32
    %23 = vector.broadcast %c0_i32_12 : i32 to vector<16x64xi32>
    %24 = arith.cmpi ne, %22, %23 : vector<16x64xi32>
    %c0_i32_13 = arith.constant 0 : i32
    %25 = vector.broadcast %c0_i32_13 : i32 to vector<16x64xi32>
    %26 = arith.cmpi slt, %22, %25 : vector<16x64xi32>
    %c0_i32_14 = arith.constant 0 : i32
    %27 = arith.cmpi slt, %20, %c0_i32_14 : i32
    %28 = vector.broadcast %27 : i1 to vector<16x64xi1>
    %29 = vector.broadcast %28 : vector<16x64xi1> to vector<16x64xi1>
    %30 = arith.xori %26, %29 : vector<16x64xi1>
    %31 = arith.andi %30, %24 : vector<16x64xi1>
    %32 = vector.broadcast %20 : i32 to vector<16x64xi32>
    %33 = arith.addi %22, %32 : vector<16x64xi32>
    %34 = arith.select %31, %33, %22 : vector<16x64xi1>, vector<16x64xi32>
    %c8_i32 = arith.constant 8 : i32
    %35 = vector.broadcast %c8_i32 : i32 to vector<16x64xi32>
    %36 = arith.cmpi slt, %34, %35 : vector<16x64xi32>
    %c56_i32 = arith.constant 56 : i32
    %37 = tpu.dynamic_rotate %9 by %c56_i32 dim 1 : vector<16x64xf32>, i32 -> vector<16x64xf32>
    %c8_i32_15 = arith.constant 8 : i32
    %38 = tpu.dynamic_rotate %9 by %c8_i32_15 dim 1 : vector<16x64xf32>, i32 -> vector<16x64xf32>
    %39 = arith.select %36, %37, %38 : vector<16x64xi1>, vector<16x64xf32>
    %40 = arith.mulf %9, %13 : vector<16x64xf32>
    %41 = arith.mulf %39, %15 : vector<16x64xf32>
    %42 = arith.addf %40, %41 : vector<16x64xf32>
    %cst_16 = arith.constant 2.500000e-01 : f32
    %43 = vector.broadcast %cst_16 : f32 to vector<16x64xf32>
    %44 = arith.mulf %42, %43 : vector<16x64xf32>
    %45 = tpu.iota {dimensions = array<i32: 1>} : vector<16x32xi32>
    %c16_i32_17 = arith.constant 16 : i32
    %c0_i32_18 = arith.constant 0 : i32
    %46 = arith.cmpi eq, %c16_i32_17, %c0_i32_18 : i32
    %c1_i32_19 = arith.constant 1 : i32
    %47 = arith.select %46, %c1_i32_19, %c16_i32_17 : i32
    %48 = vector.broadcast %47 : i32 to vector<16x32xi32>
    %49 = arith.remsi %45, %48 : vector<16x32xi32>
    %c0_i32_20 = arith.constant 0 : i32
    %50 = vector.broadcast %c0_i32_20 : i32 to vector<16x32xi32>
    %51 = arith.cmpi ne, %49, %50 : vector<16x32xi32>
    %c0_i32_21 = arith.constant 0 : i32
    %52 = vector.broadcast %c0_i32_21 : i32 to vector<16x32xi32>
    %53 = arith.cmpi slt, %49, %52 : vector<16x32xi32>
    %c0_i32_22 = arith.constant 0 : i32
    %54 = arith.cmpi slt, %47, %c0_i32_22 : i32
    %55 = vector.broadcast %54 : i1 to vector<16x32xi1>
    %56 = vector.broadcast %55 : vector<16x32xi1> to vector<16x32xi1>
    %57 = arith.xori %53, %56 : vector<16x32xi1>
    %58 = arith.andi %57, %51 : vector<16x32xi1>
    %59 = vector.broadcast %47 : i32 to vector<16x32xi32>
    %60 = arith.addi %49, %59 : vector<16x32xi32>
    %61 = arith.select %58, %60, %49 : vector<16x32xi1>, vector<16x32xi32>
    %c8_i32_23 = arith.constant 8 : i32
    %62 = vector.broadcast %c8_i32_23 : i32 to vector<16x32xi32>
    %63 = arith.cmpi slt, %61, %62 : vector<16x32xi32>
    %c24_i32 = arith.constant 24 : i32
    %64 = tpu.dynamic_rotate %10 by %c24_i32 dim 1 : vector<16x32xf32>, i32 -> vector<16x32xf32>
    %c8_i32_24 = arith.constant 8 : i32
    %65 = tpu.dynamic_rotate %10 by %c8_i32_24 dim 1 : vector<16x32xf32>, i32 -> vector<16x32xf32>
    %66 = arith.select %63, %64, %65 : vector<16x32xi1>, vector<16x32xf32>
    %67 = arith.mulf %10, %16 : vector<16x32xf32>
    %68 = arith.mulf %66, %17 : vector<16x32xf32>
    %69 = arith.addf %67, %68 : vector<16x32xf32>
    %70 = tpu.iota {dimensions = array<i32: 0>} : vector<32x16xi32>
    %71 = tpu.iota {dimensions = array<i32: 1>} : vector<32x16xi32>
    %c16_i32_25 = arith.constant 16 : i32
    %c0_i32_26 = arith.constant 0 : i32
    %72 = arith.cmpi eq, %c16_i32_25, %c0_i32_26 : i32
    %c1_i32_27 = arith.constant 1 : i32
    %73 = arith.select %72, %c1_i32_27, %c16_i32_25 : i32
    %74 = vector.broadcast %73 : i32 to vector<32x16xi32>
    %75 = arith.remsi %70, %74 : vector<32x16xi32>
    %c0_i32_28 = arith.constant 0 : i32
    %76 = vector.broadcast %c0_i32_28 : i32 to vector<32x16xi32>
    %77 = arith.cmpi ne, %75, %76 : vector<32x16xi32>
    %c0_i32_29 = arith.constant 0 : i32
    %78 = vector.broadcast %c0_i32_29 : i32 to vector<32x16xi32>
    %79 = arith.cmpi slt, %75, %78 : vector<32x16xi32>
    %c0_i32_30 = arith.constant 0 : i32
    %80 = arith.cmpi slt, %73, %c0_i32_30 : i32
    %81 = vector.broadcast %80 : i1 to vector<32x16xi1>
    %82 = vector.broadcast %81 : vector<32x16xi1> to vector<32x16xi1>
    %83 = arith.xori %79, %82 : vector<32x16xi1>
    %84 = arith.andi %83, %77 : vector<32x16xi1>
    %85 = vector.broadcast %73 : i32 to vector<32x16xi32>
    %86 = arith.addi %75, %85 : vector<32x16xi32>
    %87 = arith.select %84, %86, %75 : vector<32x16xi1>, vector<32x16xi32>
    %88 = arith.cmpi sle, %71, %87 : vector<32x16xi32>
    %cst_31 = arith.constant 0.000000e+00 : f32
    %cst_32 = arith.constant -1.000000e+30 : f32
    %89 = vector.broadcast %cst_31 : f32 to vector<32x16xf32>
    %90 = vector.broadcast %cst_32 : f32 to vector<32x16xf32>
    %91 = arith.select %88, %89, %90 : vector<32x16xi1>, vector<32x16xf32>
    %92 = vector.extract_strided_slice %69 {offsets = [0, 0], sizes = [16, 16], strides = [1, 1]} : vector<16x32xf32> to vector<16x16xf32>
    %93 = vector.extract_strided_slice %11 {offsets = [0, 0], sizes = [16, 16], strides = [1, 1]} : vector<16x32xf32> to vector<16x16xf32>
    %94 = vector.extract_strided_slice %44 {offsets = [0, 0], sizes = [16, 16], strides = [1, 1]} : vector<16x64xf32> to vector<16x16xf32>
    %95 = vector.extract_strided_slice %44 {offsets = [0, 16], sizes = [16, 16], strides = [1, 1]} : vector<16x64xf32> to vector<16x16xf32>
    %96 = tpu.concatenate %94, %95 in 0 : vector<16x16xf32>, vector<16x16xf32> -> vector<32x16xf32>
    %cst_33 = arith.constant dense<0.000000e+00> : vector<32x16xf32>
    %97 = tpu.matmul %96, %92, %cst_33 {dimension_numbers = #tpu.dot_dimension_numbers<[1], [1], [0], [0], [0, 0, 1, 0], [], []>} : vector<32x16xf32>, vector<16x16xf32>, vector<32x16xf32> -> vector<32x16xf32>
    %98 = arith.addf %97, %91 : vector<32x16xf32>
    %cst_34 = arith.constant dense<0xFF800000> : vector<32xf32>
    %99 = vector.multi_reduction <maximumf>, %98, %cst_34 [1] : vector<32x16xf32> to vector<32xf32>
    %100 = vector.shape_cast %99 : vector<32xf32> to vector<32x1xf32>
    %101 = vector.broadcast %100 : vector<32x1xf32> to vector<32x16xf32>
    %102 = arith.subf %98, %101 : vector<32x16xf32>
    %103 = math.exp %102 : vector<32x16xf32>
    %cst_35 = arith.constant dense<0.000000e+00> : vector<32xf32>
    %104 = vector.multi_reduction <add>, %103, %cst_35 [1] : vector<32x16xf32> to vector<32xf32>
    %105 = vector.shape_cast %104 : vector<32xf32> to vector<32x1xf32>
    %cst_36 = arith.constant dense<0.000000e+00> : vector<32x16xf32>
    %106 = tpu.matmul %103, %93, %cst_36 {dimension_numbers = #tpu.dot_dimension_numbers<[1], [0], [0], [1], [0, 0, 1, 1], [], []>} : vector<32x16xf32>, vector<16x16xf32>, vector<32x16xf32> -> vector<32x16xf32>
    %107 = vector.broadcast %105 : vector<32x1xf32> to vector<32x16xf32>
    %108 = arith.divf %106, %107 : vector<32x16xf32>
    %109 = vector.extract_strided_slice %108 {offsets = [0, 0], sizes = [16, 16], strides = [1, 1]} : vector<32x16xf32> to vector<16x16xf32>
    %c0_37 = arith.constant 0 : index
    %c0_38 = arith.constant 0 : index
    %110 = vector.load %arg7[%c0_37, %c0_38] : memref<16x64xf32, #tpu.memory_space<vmem>>, vector<16x16xf32>
    tpu.vector_store %arg7[%c0_37, %c0_38], %109 {strides = array<i32>} : memref<16x64xf32, #tpu.memory_space<vmem>>, vector<16x16xf32>,
    %111 = vector.extract_strided_slice %108 {offsets = [16, 0], sizes = [16, 16], strides = [1, 1]} : vector<32x16xf32> to vector<16x16xf32>
    %c0_39 = arith.constant 0 : index
    %c16 = arith.constant 16 : index
    %112 = vector.load %arg7[%c0_39, %c16] : memref<16x64xf32, #tpu.memory_space<vmem>>, vector<16x16xf32>
    tpu.vector_store %arg7[%c0_39, %c16], %111 {strides = array<i32>} : memref<16x64xf32, #tpu.memory_space<vmem>>, vector<16x16xf32>,
    %113 = vector.extract_strided_slice %69 {offsets = [0, 16], sizes = [16, 16], strides = [1, 1]} : vector<16x32xf32> to vector<16x16xf32>
    %114 = vector.extract_strided_slice %11 {offsets = [0, 16], sizes = [16, 16], strides = [1, 1]} : vector<16x32xf32> to vector<16x16xf32>
    %115 = vector.extract_strided_slice %44 {offsets = [0, 32], sizes = [16, 16], strides = [1, 1]} : vector<16x64xf32> to vector<16x16xf32>
    %116 = vector.extract_strided_slice %44 {offsets = [0, 48], sizes = [16, 16], strides = [1, 1]} : vector<16x64xf32> to vector<16x16xf32>
    %117 = tpu.concatenate %115, %116 in 0 : vector<16x16xf32>, vector<16x16xf32> -> vector<32x16xf32>
    %cst_40 = arith.constant dense<0.000000e+00> : vector<32x16xf32>
    %118 = tpu.matmul %117, %113, %cst_40 {dimension_numbers = #tpu.dot_dimension_numbers<[1], [1], [0], [0], [0, 0, 1, 0], [], []>} : vector<32x16xf32>, vector<16x16xf32>, vector<32x16xf32> -> vector<32x16xf32>
    %119 = arith.addf %118, %91 : vector<32x16xf32>
    %cst_41 = arith.constant dense<0xFF800000> : vector<32xf32>
    %120 = vector.multi_reduction <maximumf>, %119, %cst_41 [1] : vector<32x16xf32> to vector<32xf32>
    %121 = vector.shape_cast %120 : vector<32xf32> to vector<32x1xf32>
    %122 = vector.broadcast %121 : vector<32x1xf32> to vector<32x16xf32>
    %123 = arith.subf %119, %122 : vector<32x16xf32>
    %124 = math.exp %123 : vector<32x16xf32>
    %cst_42 = arith.constant dense<0.000000e+00> : vector<32xf32>
    %125 = vector.multi_reduction <add>, %124, %cst_42 [1] : vector<32x16xf32> to vector<32xf32>
    %126 = vector.shape_cast %125 : vector<32xf32> to vector<32x1xf32>
    %cst_43 = arith.constant dense<0.000000e+00> : vector<32x16xf32>
    %127 = tpu.matmul %124, %114, %cst_43 {dimension_numbers = #tpu.dot_dimension_numbers<[1], [0], [0], [1], [0, 0, 1, 1], [], []>} : vector<32x16xf32>, vector<16x16xf32>, vector<32x16xf32> -> vector<32x16xf32>
    %128 = vector.broadcast %126 : vector<32x1xf32> to vector<32x16xf32>
    %129 = arith.divf %127, %128 : vector<32x16xf32>
    %130 = vector.extract_strided_slice %129 {offsets = [0, 0], sizes = [16, 16], strides = [1, 1]} : vector<32x16xf32> to vector<16x16xf32>
    %c0_44 = arith.constant 0 : index
    %c32 = arith.constant 32 : index
    %131 = vector.load %arg7[%c0_44, %c32] : memref<16x64xf32, #tpu.memory_space<vmem>>, vector<16x16xf32>
    tpu.vector_store %arg7[%c0_44, %c32], %130 {strides = array<i32>} : memref<16x64xf32, #tpu.memory_space<vmem>>, vector<16x16xf32>,
    %132 = vector.extract_strided_slice %129 {offsets = [16, 0], sizes = [16, 16], strides = [1, 1]} : vector<32x16xf32> to vector<16x16xf32>
    %c0_45 = arith.constant 0 : index
    %c48 = arith.constant 48 : index
    %133 = vector.load %arg7[%c0_45, %c48] : memref<16x64xf32, #tpu.memory_space<vmem>>, vector<16x16xf32>
    tpu.vector_store %arg7[%c0_45, %c48], %132 {strides = array<i32>} : memref<16x64xf32, #tpu.memory_space<vmem>>, vector<16x16xf32>,
    %c0_46 = arith.constant 0 : index
    %c0_47 = arith.constant 0 : index
    %134 = vector.load %arg7[%c0_46, %c0_47] : memref<16x64xf32, #tpu.memory_space<vmem>>, vector<16x64xf32>
    %135 = arith.truncf %134 : vector<16x64xf32> to vector<16x64xbf16>
    %c0_48 = arith.constant 0 : index
    %c0_49 = arith.constant 0 : index
    %136 = vector.load %arg3[%c0_48, %c0_49] : memref<64x64xbf16, #tpu.memory_space<vmem>>, vector<64x64xbf16>
    %cst_50 = arith.constant dense<0.000000e+00> : vector<16x64xf32>
    %137 = tpu.matmul %135, %136, %cst_50 {dimension_numbers = #tpu.dot_dimension_numbers<[1], [0], [0], [1], [0, 0, 1, 1], [], []>} : vector<16x64xbf16>, vector<64x64xbf16>, vector<16x64xf32> -> vector<16x64xf32>
    %c0_51 = arith.constant 0 : index
    %c0_52 = arith.constant 0 : index
    %c0_53 = arith.constant 0 : index
    %138 = vector.load %arg6[%c0_51, %c0_52, %c0_53] : memref<1x16x64xf32, #tpu.memory_space<vmem>>, vector<1x16x64xf32>
    %139 = vector.shape_cast %138 : vector<1x16x64xf32> to vector<16x64xf32>
    %140 = vector.shape_cast %137 : vector<16x64xf32> to vector<1x16x64xf32>
    tpu.vector_store %arg6[%c0_51, %c0_52, %c0_53], %140 {strides = array<i32>} : memref<1x16x64xf32, #tpu.memory_space<vmem>>, vector<1x16x64xf32>,
    return
  }
  func.func @transform_0(%arg0: i32) -> (i32, i32, i32) {
    %c0_i32 = arith.constant 0 : i32
    %c0_i32_0 = arith.constant 0 : i32
    %c0_i32_1 = arith.constant 0 : i32
    return %arg0, %c0_i32, %c0_i32_0 : i32, i32, i32
  }
  func.func @transform_1(%arg0: i32) -> (i32, i32) {
    %c0_i32 = arith.constant 0 : i32
    %c0_i32_0 = arith.constant 0 : i32
    %c0_i32_1 = arith.constant 0 : i32
    return %c0_i32, %c0_i32_0 : i32, i32
  }
  func.func @transform_2(%arg0: i32) -> (i32, i32) {
    %c0_i32 = arith.constant 0 : i32
    %c0_i32_0 = arith.constant 0 : i32
    %c0_i32_1 = arith.constant 0 : i32
    return %c0_i32, %c0_i32_0 : i32, i32
  }
  func.func @transform_3(%arg0: i32) -> (i32, i32, i32) {
    %c0_i32 = arith.constant 0 : i32
    %c0_i32_0 = arith.constant 0 : i32
    %c0_i32_1 = arith.constant 0 : i32
    return %arg0, %c0_i32, %c0_i32_0 : i32, i32, i32
  }
  func.func @transform_4(%arg0: i32) -> (i32, i32, i32) {
    %c0_i32 = arith.constant 0 : i32
    %c0_i32_0 = arith.constant 0 : i32
    %c0_i32_1 = arith.constant 0 : i32
    return %arg0, %c0_i32, %c0_i32_0 : i32, i32, i32
  }
  func.func @transform_5(%arg0: i32) -> (i32, i32, i32) {
    %c0_i32 = arith.constant 0 : i32
    %c0_i32_0 = arith.constant 0 : i32
    %c0_i32_1 = arith.constant 0 : i32
    return %arg0, %c0_i32, %c0_i32_0 : i32, i32, i32
  }
}

</mosaic_0001>

<bundles_post_ra>
// kernel: tpu_custom_call.1
= control target key start
LH: loop header
LB: loop body
LE: loop exit
PB: predicated region body
PF: predicated region fallthrough
CT: control target
= control target key end

     0   :  { %s2426_s0 = inlined_call_operand.hbm [shape: f32[2,16,64], index: 0, kind: input, shape index: {}]   ;;  %s2427_s1 = inlined_call_operand.hbm [shape: bf16[64,128], index: 1, kind: input, shape index: {}]   ;;  %s2428_s2 = inlined_call_operand.hbm [shape: bf16[64,64], index: 2, kind: input, shape index: {}]   ;;  %s2429_s3 = inlined_call_operand.hbm [shape: f32[2,16,64], index: 3, kind: input, shape index: {}]   ;;  %s2430_s4 = inlined_call_operand.hbm [shape: f32[2,16,64], index: 4, kind: input, shape index: {}]   ;;  %s2431_s5 = inlined_call_operand.hbm [shape: f32[2,16,64], index: 5, kind: output, shape index: {}]  }
   0x1   :  { %2446 = sst [smem:[#allocation18_spill]] %s2426_s0 }
   0x2   :  { %2447 = sst [smem:[#allocation19_spill]] %s2427_s1 }
   0x3   :  { %2448 = sst [smem:[#allocation20_spill]] %s2429_s3 }
   0x4   :  { %10 = vsyncpa [#allocation4], 0 }
   0x5   :  { %12 = vsyncpa [#allocation4 + $0x1], 0 }
   0x6   :  { %13 = vsyncpa [#allocation7], 0 }
   0x7   :  { %14 = vsyncpa [#allocation10], 0 }
   0x8   :  { %16 = vsyncpa [#allocation10 + $0x1], 0 }
   0x9   :  { %17 = vsyncpa [#allocation5], 0 }
   0xa   :  { %19 = vsyncpa [#allocation5 + $0x1], 0  ;;  %s1947_s18 = smov 0   ;;  %s1949_s19 = smov 0  }
   0xb   :  { %s1951_s20 = smov 0   ;;  %s1953_s21 = smov 0  }
   0xc LB: > { %s1968_s22 = sadd.s32 4294967295, %s1891_s21   ;;  %s1388_s23 = sadd.s32 4294967294, %s1891_s21   ;;  %s1891_s21 = sphi %s1953_s21, %s2481_s21   ;;  %s1887_s20 = sphi %s1951_s20, %s2480_s20   ;;  %s1883_s19 = sphi %s1949_s19, %s2479_s19   ;;  %s1879_s18 = sphi %s1947_s18, %s2478_s18  }
   0xd   : > { %s1972_s24 = sadd.s32 1, %s1891_s21   ;;  %s32_s25 = sadd.s32 1, %s1887_s20 }
   0xe   : > { %s29_s26 = ssub.s32 %s1891_s21, %s1972_s24  ;;  %p39_p0 = scmp.ne.s32.totalorder %s1887_s20, %s1883_s19 }
   0xf   : > { %p30_p1 = scmp.eq.s32.totalorder %s29_s26, 0  ;;  %p40_p2 = scmp.eq.s32.totalorder %s1891_s21, 0 }
  0x10   : > { %p45_p3 = scmp.ne.s32.totalorder %s1883_s19, %s1879_s18  ;;  %p2432_p4 = scmp.eq.s32.totalorder %s1968_s22, 0 }
  0x11   : > { %s1984_s27 = scalar_select %p30_p1, %s1887_s20, %s32_s25  }
  0x12   : > { %p1986_p5 = por %p40_p2, %p39_p0  ;;  %p1992_p6 = por %p2432_p4, %p45_p3 }
  0x13   : > { %2449 = sst [smem:[#allocation17_spill]] %s1984_s27  ;;  %p163_p7 = scmp.eq.s32.totalorder %s1968_s22, 1 }
  0x14   : > { %s2451_s29 = scalar_select %p1992_p6, 1, 0 }
  0x15   : > { %p169_p8 = scmp.eq.s32.totalorder %s1388_s23, 1  ;;  %p1389_p9 = scmp.ge.s32.totalorder %s1891_s21, 1 }
  0x16   : > { %p176_p10 = scmp.lt.s32.totalorder %s1891_s21, 3  ;;  %p1999_p11 = por %p163_p7, %p39_p0 }
  0x17   : > { %p2003_p12 = por %p169_p8, %p45_p3  ;;  %s1893_s8 = smov [#allocation6]  }
  0x18   : > { %s2452_s30 = scalar_select %p1999_p11, 1, 0 }
  0x19   : > { %s2453_s6 = scalar_select %p2003_p12, 1, 0 }
  0x1a   : > { %p2007_p13 = pnand %p1389_p9, %p176_p10  ;;  %s188_s9 = sshll.u32 %s1893_s8, 4  ;;  %s189_s9 = int_to_ptr.vmem [resolvable:$true] %s188_s9 }
  0x1b   : > { %p1587_p3 = scmp.lt.s32.totalorder %s1891_s21, 2  ;;  %s2434_s11 = sand.u32 1, %s1887_s20  }
  0x1c   : > { %s2454_s7 = scalar_select %p2007_p13, 1, 0 }
  0x1d   : > { %p1564_p1 = pneg %p2007_p13  ;;  %s2024_s12 = sshll.u32 %s2434_s11, 4 }
  0x1e   : > { %s1694_s13 = scalar_lea.vmem %s189_s9, 512 }
  0x1f   : > { %p2015_p2 = pnand %p1564_p1, %p2432_p4  ;;  %p1695_p8 = scmp.ne.s32.totalorder %s189_s9, %s1694_s13 }
  0x20   : > { %p1702_p1 = scmp.lt.s32.totalorder %s189_s9, %s189_s9  ;;  %p1703_p4 = scmp.lt.s32.totalorder %s1694_s13, %s1694_s13 }
  0x21   : > { %s2455_s10 = scalar_select %p2015_p2, 1, 0 }
  0x22   : > { %p2437_p7 = pneg %p2015_p2  ;;  %p1704_p12 = por %p1703_p4, %p1702_p1 }
  0x24   : > { %p1697_p9 = pnand %p1695_p8, %p2437_p7 }
  0x26   : > { %p1698_p10 = pneg %p1697_p9 }
  0x28   : > { %p1705_p11 = pnand %p1704_p12, %p1698_p10 }
  0x2a   : > { %1708 = shalt.err (!%p1705_p11)
}
  0x2b   : > { %s2435_s14 = smov 64   ;;  %s2436_s15 = smov 4  }
  0x2c   : > { %s2456_s1 = sld [smem:[#allocation19_spill]]  ;;  %s2040_s23 = sshll.u32 %s1891_s21, 8 }
  0x2d   : > { %p2046_p4 = pnand %p1587_p3, %p1986_p5  ;;  %s236_s26 = sand.u32 1, %s1891_s21  }
  0x2e   : > { %s2458_s3 = sld [smem:[#allocation20_spill]]  ;;  %s2060_s28 = scalar_lea.sflag [#allocation10], %s236_s26 }
  0x2f   : > { %p2066_p11 = pneg %p2046_p4 }
  0x32   : > { %1567 = dma.hbm_to_vmem [thread:$0]  (!%p2015_p2), %s2456_s1, 512, %s189_s9, [#allocation7], %s2435_s14, %s2435_s14, %s2436_s15  }
  0x33   : > { %s240_s9 = scalar_lea.vmem [#allocation9], %s2024_s12 }
  0x34   : > { %s2055_s11 = scalar_lea.hbm %s2458_s3, %s2040_s23  ;;  %s247_s16 = sshll.u32 %s240_s9, 4  ;;  %s2058_s16 = int_to_ptr.vmem [resolvable:$true] %s247_s16 }
  0x35   : > { %s1709_s17 = scalar_lea.hbm %s2055_s11, 256  ;;  %s1714_s15 = scalar_lea.hbm %s2458_s3, 512 }
  0x36   : > { %p1710_p5 = scmp.ne.s32.totalorder %s2055_s11, %s1709_s17  ;;  %p1715_p8 = scmp.lt.s32.totalorder %s2055_s11, %s2458_s3 }
  0x37   : > { %p1716_p9 = scmp.lt.s32.totalorder %s1714_s15, %s1709_s17 }
  0x38   : > { %p1712_p12 = pnand %p2066_p11, %p1710_p5 }
  0x39   : > { %p1717_p10 = por %p1716_p9, %p1715_p8 }
  0x3a   : > { %p1713_p3 = pneg %p1712_p12 }
  0x3c   : > { %p1718_p1 = pnand %p1717_p10, %p1713_p3 }
  0x3e   : > { %1721 = shalt.err (!%p1718_p1)
}
  0x3f   : > { %s1722_s26 = scalar_lea.vmem %s2058_s16, 256  ;;  %s1896_s27 = smov [#allocation9]  }
  0x40   : > { %p1723_p0 = scmp.ne.s32.totalorder %s2058_s16, %s1722_s26  ;;  %s1727_s8 = sshll.u32 %s1896_s27, 4  ;;  %s1728_s8 = int_to_ptr.vmem [resolvable:$false] %s1727_s8 }
  0x41   : > { %s1729_s13 = scalar_lea.vmem %s1728_s8, 512  ;;  %p1730_p7 = scmp.lt.s32.totalorder %s2058_s16, %s1728_s8 }
  0x42   : > { %p1725_p5 = pnand %p1723_p0, %p2066_p11  ;;  %p1731_p6 = scmp.lt.s32.totalorder %s1729_s13, %s1722_s26 }
  0x44   : > { %p1726_p12 = pneg %p1725_p5  ;;  %p1732_p13 = por %p1731_p6, %p1730_p7 }
  0x46   : > { %p1733_p2 = pnand %p1732_p13, %p1726_p12 }
  0x48   : > { %1736 = shalt.err (!%p1733_p2)
}
  0x49   : > { %s2442_s1 = smov 128   ;;  %s2444_s15 = smov 8  }
  0x4a   : > { %1577 = dma.hbm_to_vmem [thread:$0]  (!%p2046_p4), %s2055_s11, 256, %s2058_s16, %s2060_s28, %s2442_s1, %s2442_s1, %s2444_s15  }
  0x4b   : > { %s1899_s27 = smov [#allocation8]   ;;  %p2460_p6 = scmp.ne.s32.totalorder %s2455_s10, 0 }
  0x4c   : > { %s201_s17 = sshll.u32 %s1899_s27, 4  ;;  %s202_s17 = int_to_ptr.vmem [resolvable:$true] %s201_s17 }
  0x4d   : > { %s1748_s9 = scalar_lea.vmem %s202_s17, 512  ;;  %p2461_p13 = pneg %p2460_p6 }
  0x4e   : > { %p1749_p0 = scmp.ne.s32.totalorder %s202_s17, %s1748_s9  ;;  %p1756_p3 = scmp.lt.s32.totalorder %s202_s17, %s202_s17 }
  0x4f   : > { %p1757_p8 = scmp.lt.s32.totalorder %s1748_s9, %s1748_s9 }
  0x50   : > { %p1751_p2 = pnand %p1749_p0, %p2461_p13 }
  0x51   : > { %p1758_p9 = por %p1757_p8, %p1756_p3 }
  0x52   : > { %p1752_p7 = pneg %p1751_p2 }
  0x54   : > { %p1759_p10 = pnand %p1758_p9, %p1752_p7 }
  0x56   : > { %1762 = shalt.err (!%p1759_p10)
}
  0x57   : > { %s2462_s26 = smov 4   ;;  %s2463_s8 = smov 64  }
  0x58   : > { %1570 = dma.hbm_to_vmem [thread:$0]  (!%p2460_p6), %s2428_s2, 512, %s202_s17, [#allocation7], %s2463_s8, %s2463_s8, %s2462_s26  }
  0x59   : > { %s2464_s0 = sld [smem:[#allocation18_spill]]  ;;  %s219_s10 = scalar_lea.vmem [#allocation3], %s2024_s12 }
  0x5a   : > { %s226_s1 = sshll.u32 %s219_s10, 4  ;;  %s2465_s15 = sand.u32 1, %s1887_s20   ;;  %s2110_s1 = int_to_ptr.vmem [resolvable:$true] %s226_s1 }
  0x5b   : > { %s216_s3 = scalar_lea.sflag [#allocation4], %s2465_s15 }
  0x5f   : > { %s2107_s9 = scalar_lea.hbm %s2464_s0, %s2040_s23  ;;  %s1768_s8 = scalar_lea.hbm %s2464_s0, 512 }
  0x60   : > { %s1763_s11 = scalar_lea.hbm %s2107_s9, 256  ;;  %p1769_p0 = scmp.lt.s32.totalorder %s2107_s9, %s2464_s0 }
  0x61   : > { %p1764_p1 = scmp.ne.s32.totalorder %s2107_s9, %s1763_s11  ;;  %p1770_p6 = scmp.lt.s32.totalorder %s1768_s8, %s1763_s11 }
  0x63   : > { %p1766_p5 = pnand %p1764_p1, %p2066_p11  ;;  %p1771_p13 = por %p1770_p6, %p1769_p0 }
  0x65   : > { %p1767_p12 = pneg %p1766_p5 }
  0x67   : > { %p1772_p2 = pnand %p1771_p13, %p1767_p12 }
  0x69   : > { %1775 = shalt.err (!%p1772_p2)
}
  0x6a   : > { %s1776_s15 = scalar_lea.vmem %s2110_s1, 256  ;;  %s1900_s27 = smov [#allocation3]  }
  0x6b   : > { %p1777_p7 = scmp.ne.s32.totalorder %s2110_s1, %s1776_s15  ;;  %s1781_s10 = sshll.u32 %s1900_s27, 4  ;;  %s1782_s10 = int_to_ptr.vmem [resolvable:$false] %s1781_s10 }
  0x6c   : > { %s1783_s17 = scalar_lea.vmem %s1782_s10, 512  ;;  %p1784_p9 = scmp.lt.s32.totalorder %s2110_s1, %s1782_s10 }
  0x6d   : > { %p1779_p3 = pnand %p1777_p7, %p2066_p11  ;;  %p1785_p10 = scmp.lt.s32.totalorder %s1783_s17, %s1776_s15 }
  0x6f   : > { %p1780_p8 = pneg %p1779_p3  ;;  %p1786_p1 = por %p1785_p10, %p1784_p9 }
  0x71   : > { %p1787_p5 = pnand %p1786_p1, %p1780_p8 }
  0x73   : > { %1790 = shalt.err (!%p1787_p5)
}
  0x74   : > { %s2466_s11 = smov 8   ;;  %s2467_s26 = smov 128  }
  0x75   : > { %1574 = dma.hbm_to_vmem [thread:$0]  (!%p2046_p4), %s2107_s9, 256, %s2110_s1, %s216_s3, %s2467_s26, %s2467_s26, %s2466_s11  }
  0x76   : > { %s2141_s13 = scalar_lea.hbm %s2430_s4, %s2040_s23  ;;  %s261_s15 = scalar_lea.vmem [#allocation11], %s2024_s12 }
  0x77   : > { %s268_s27 = sshll.u32 %s261_s15, 4  ;;  %s1791_s10 = scalar_lea.hbm %s2141_s13, 256  ;;  %s269_s27 = int_to_ptr.vmem [resolvable:$true] %s268_s27 }
  0x78   : > { %p1792_p12 = scmp.ne.s32.totalorder %s2141_s13, %s1791_s10  ;;  %s1796_s3 = scalar_lea.hbm %s2430_s4, 512 }
  0x79   : > { %p1797_p13 = scmp.lt.s32.totalorder %s2141_s13, %s2430_s4  ;;  %p1798_p2 = scmp.lt.s32.totalorder %s1796_s3, %s1791_s10 }
  0x7a   : > { %p1794_p0 = pnand %p1792_p12, %p2066_p11 }
  0x7b   : > { %p1799_p7 = por %p1798_p2, %p1797_p13 }
  0x7c   : > { %p1795_p6 = pneg %p1794_p0 }
  0x7e   : > { %p1800_p3 = pnand %p1799_p7, %p1795_p6 }
  0x80   : > { %1803 = shalt.err (!%p1800_p3)
}
  0x81   : > { %s1804_s12 = scalar_lea.vmem %s269_s27, 256  ;;  %s1901_s23 = smov [#allocation11]  }
  0x82   : > { %p1805_p8 = scmp.ne.s32.totalorder %s269_s27, %s1804_s12  ;;  %s1809_s8 = sshll.u32 %s1901_s23, 4  ;;  %s1810_s8 = int_to_ptr.vmem [resolvable:$false] %s1809_s8 }
  0x83   : > { %s1811_s16 = scalar_lea.vmem %s1810_s8, 512  ;;  %p1812_p1 = scmp.lt.s32.totalorder %s269_s27, %s1810_s8 }
  0x84   : > { %p1807_p9 = pnand %p1805_p8, %p2066_p11  ;;  %p1813_p5 = scmp.lt.s32.totalorder %s1811_s16, %s1804_s12 }
  0x86   : > { %p1808_p10 = pneg %p1807_p9  ;;  %p1814_p12 = por %p1813_p5, %p1812_p1 }
  0x88   : > { %p1815_p0 = pnand %p1814_p12, %p1808_p10 }
  0x8a   : > { %1818 = shalt.err (!%p1815_p0)
}
  0x8b   : > { %1580 = dma.hbm_to_vmem [thread:$0]  (!%p2046_p4), %s2141_s13, 256, %s269_s27, %s2060_s28, %s2467_s26, %s2467_s26, %s2466_s11  }
  0x8c   : > { %p2468_p11 = scmp.ne.s32.totalorder %s2454_s7, 0 }
  0x8d   : > { %s2167_s0 = sand.u32 (!%p2468_p11), 1, %s1883_s19   ;;  %p2469_p6 = scmp.ne.s32.totalorder (!%p2468_p11), %s2451_s29, 0 }
  0x8e   : > { %280 = sbr.rel (%p2468_p11) target bundleno = 2348 (0x92c), region = 40  ;;  %s2170_s14 = sshll.u32 (!%p2468_p11), %s2167_s0, 4 }
  0x8f   : > { %s283_s15 = scalar_lea.sflag (!%p2468_p11), [#allocation4], %s2167_s0  ;;  %s286_s25 = scalar_lea.vmem (!%p2468_p11), [#allocation3], %s2170_s14 }
  0x93   : > { %1862 = dma.done.wait (%p2469_p6), %s283_s15, 256  }
  0x94   : > { %1864 = vsyncadd (%p2469_p6), %s283_s15, 4294967040  ;;  %p2470_p4 = scmp.eq.s32.totalorder %s1968_s22, 0 }
  0x96   : > { %1866 = dma.done.wait (%p2470_p4), [#allocation7], 1024   ;;  %p2471_p13 = pmov %p2470_p4 }
  0x97   : > { %s299_s7 = sand.u32 1, %s1968_s22   ;;  %s303_s11 = scalar_lea.vmem [#allocation9], %s2170_s14 }
  0x98   : > { %1868 = vsyncadd (%p2471_p13), [#allocation7], 4294966272  ;;  %s300_s28 = scalar_lea.sflag [#allocation10], %s299_s7 }
  0x99   : > { %1870 = dma.done.wait (%p2469_p6), %s300_s28, 512  }
  0x9a   : > { %1872 = vsyncadd (%p2469_p6), %s300_s28, 4294966784  ;;  %v1902_v0 = vmov 0.0   ;;  %vm1903_vm0 = vmmov 0   ;;  %v1643_v1 = vld [vmem:[#allocation6 + $0x18] sm:$0xff]   ;;  %v1644_v2 = vld [vmem:[#allocation6 + $0x10] sm:$0xff]   ;;  %vm385_vm1 = vcmask 523264   ;;  %v438_v30 = vlaneseq }
  0x9b   : > { %1484 = vmatprep.subr.bf16.mxu0 %v1902_v0  ;;  %1492 = vmatprep.mubr.msk.bf16.mxu0 %vm1903_vm0, %v1902_v0  ;;  %v1645_v3 = vld [vmem:[#allocation6 + $0x8] sm:$0xff]   ;;  %v1646_v4 = vld [vmem:[#allocation6] sm:$0xff]   ;;  %s1904_s29 = smov 64   ;;  %s1905_s26 = smov 32   ;;  %vm498_vm2 = vcmask 1047808   ;;  %vm453_vm3 = vcmask 1048064  }
  0x9c   : > { %1485 = vmatpush3.bf16.msra.mxu0 %v1643_v1  ;;  %v350_v5 = vld [vmem:[%s286_s25] sm:$0xff]  ;;  %v351_v6 = vld [vmem:[%s286_s25 + $0x8] sm:$0xff]  ;;  %s1906_s13 = smov 120   ;;  %s1907_s27 = smov 104   ;;  %v2233_v31 = vand.u32 127, %v438_v30  ;;  %vm622_vm5 = vcmask 130048  }
  0x9d   : > { %1486 = vmatprep.subr.bf16.mxu0 %v1902_v0  ;;  %v352_v7 = vpack.c.bf16 %v351_v6, %v350_v5  ;;  %v435_v28 = vld [vmem:[%s303_s11 + $0x8] sm:$0xff]  ;;  %v434_v29 = vld [vmem:[%s303_s11] sm:$0xff]  ;;  %s312_s10 = scalar_lea.vmem [#allocation11], %s2170_s14  ;;  %s1908_s17 = smov 72   ;;  %vm877_vm10 = vcmask 261248   ;;  %vm1144_vm11 = vcmask 392448  }
  0x9e   : > { %v444_v33 = vand.u32 15, %v2233_v31  ;;  %v436_v35 = vld [vmem:[%s312_s10] sm:$0xff]  ;;  %v437_v41 = vld [vmem:[%s312_s10 + $0x8] sm:$0xff]  ;;  %s1909_s3 = smov 112   ;;  %s1911_s1 = smov 48   ;;  %vm1155_vm12 = vcmask 523648  }
  0x9f   : > { %s1912_s9 = smov 96   ;;  %s1913_s12 = smov 16  }
  0xa0   : > { %1487 = vmatpush3.bf16.msra.mxu0 %v1644_v2  ;;  %vm2237_vm4 = vcmp.lt.s32.totalorder %v444_v33, 8  ;;  %s348_s23 = scalar_lea.vmem [#allocation12], %s2170_s14  ;;  %s1449_s16 = sshll.u32 %s1968_s22, 8 }
  0xa1   : > { %1488 = vmatprep.subr.bf16.mxu0 %v1902_v0  ;;  %s1253_s8 = sshll.u32 %s348_s23, 4  ;;  %s2382_s7 = scalar_lea.hbm %s2431_s5, %s1449_s16  ;;  %s2377_s8 = int_to_ptr.vmem [resolvable:$true] %s1253_s8 }
  0xa2   : > { %s1240_s14 = scalar_lea.sflag [#allocation5], %s2167_s0  ;;  %s1819_s22 = scalar_lea.vmem %s2377_s8, 256 }
  0xa3   : > { %p1820_p2 = scmp.ne.s32.totalorder %s2377_s8, %s1819_s22  ;;  %p2474_p7 = scmp.ne.s32.totalorder %s2452_s30, 0 }
  0xa4   : > { %1489 = vmatpush3.bf16.msra.mxu0 %v1645_v3  ;;  %s1914_s28 = smov [#allocation12]  }
  0xa5   : > { %1490 = vmatprep.subr.bf16.mxu0 %v1902_v0  ;;  %p1821_p3 = pnand %p1820_p2, %p2474_p7  ;;  %s1823_s11 = sshll.u32 %s1914_s28, 4  ;;  %s1824_s11 = int_to_ptr.vmem [resolvable:$false] %s1823_s11 }
  0xa6   : > { %p1826_p9 = scmp.lt.s32.totalorder %s2377_s8, %s1824_s11 }
  0xa7   : > { %p1822_p8 = pneg %p1821_p3 }
  0xa8   : > { %1491 = vmatpush3.bf16.msra.mxu0 %v1646_v4 }
  0xa9   : > { %1536 = vmatprep.subr.bf16.mxu0 %v1902_v0 }
  0xab   : > { %1493 = vmatmul.mubr.msk.bf16.vlgmr.msra.gmra.mxu0 %vm385_vm1, %v352_v7 }
  0xac   : > { %1544 = vmatprep.mubr.msk.bf16.mxu0 %vm1903_vm0, %v1902_v0 }
 0x16b   : > { %v423_v8 = vpop.f32.mrf.mxu0 }
 0x16c   : > { %v2202_v13 = vclamps-f32 %v423_v8, 8.0 }
 0x16d   : > { %v1494_v9 = vpop.f32.mrf.mxu0 }
 0x16e   : > { %v482_v59 = vmul.f32 %v2202_v13, %v434_v29 }
 0x16f   : > { %v426_v10 = vpop.f32.mrf.mxu0 }
 0x170   : > { %v2198_v11 = vclamps-f32 %v426_v10, 8.0 }
 0x171   : > { %v1495_v12 = vpop.f32.mrf.mxu0 }
 0x172   : > { %494 = vrot.lane.b32.xlu0 %v2198_v11, %s1904_s29  ;;  %v483_v2 = vmul.f32 %v2198_v11, %v435_v28 }
 0x176   : > { %492 = vrot.lane.b32.xlu0 %v2202_v13, %s1904_s29 }
 0x1e4   : > { %v495_v14 = vpop.permute.xlu0 %494 }
 0x1e5   : > { %502 = vrot.lane.b32.xlu1 %v495_v14, %s1905_s26 }
 0x1e8   : > { %v493_v15 = vpop.permute.xlu0 %492 }
 0x1e9   : > { %499 = vrot.lane.b32.xlu1 %v493_v15, %s1905_s26 }
 0x257   : > { %v503_v16 = vpop.permute.xlu1 %502 }
 0x258   : > { %v504_v17 = vsel %vm498_vm2, %v503_v16, %v495_v14 }
 0x259   : > { %507 = vrot.lane.b32.xlu0 %v504_v17, %s1905_s26 }
 0x25b   : > { %v500_v18 = vpop.permute.xlu1 %499 }
 0x25c   : > { %v501_v19 = vsel %vm498_vm2, %v500_v18, %v493_v15 }
 0x25d   : > { %454 = vrot.lane.b32.xlu0 %v2202_v13, %s1904_s29  ;;  %505 = vrot.lane.b32.xlu1 %v501_v19, %s1905_s26 }
 0x261   : > { %457 = vrot.lane.b32.xlu1 %v2198_v11, %s1904_s29 }
 0x2cb   : > { %v508_v20 = vpop.permute.xlu0 %507 }
 0x2cc   : > { %v510_v21 = vsel %vm498_vm2, %v508_v20, %v495_v14  ;;  %v550_v14 = vshrl.u32 %v438_v30, 7 }
 0x2cd   : > { %515 = vrot.lane.b32.xlu0 %v510_v21, %s1906_s13  ;;  %521 = vrot.lane.b32.xlu1 %v510_v21, %s1907_s27  ;;  %v1910_v21 = vmov -1e+30  }
 0x2ce   : > { %v553_v17 = vadd.s32 24, %v550_v14  ;;  %v558_v18 = vand.u32 15, %v550_v14  ;;  %v552_v19 = vadd.s32 16, %v550_v14 }
 0x2cf   : > { %v506_v22 = vpop.permute.xlu1 %505  ;;  %v455_v24 = vpop.permute.xlu0 %454 }
 0x2d0   : > { %v509_v23 = vsel %vm498_vm2, %v506_v22, %v493_v15  ;;  %v456_v26 = vsel %vm453_vm3, %v455_v24, %v2202_v13  ;;  %v551_v15 = vadd.s32 8, %v550_v14  ;;  %v579_v20 = vand.u32 15, %v553_v17 }
 0x2d1   : > { %519 = vrot.lane.b32.xlu1 %v509_v23, %s1907_s27  ;;  %513 = vrot.lane.b32.xlu0 %v509_v23, %s1906_s13  ;;  %vm602_vm7 = vcmp.le.s32.totalorder %v2233_v31, %v558_v18  ;;  %v572_v23 = vand.u32 15, %v552_v19 }
 0x2d2   : > { %v565_v16 = vand.u32 15, %v551_v15  ;;  %vm605_vm8 = vcmp.le.s32.totalorder %v2233_v31, %v579_v20 }
 0x2d3   : > { %v458_v25 = vpop.permute.xlu1 %457  ;;  %v2290_v30 = vsel %vm605_vm8, 0.0, %v1910_v21  ;;  %vm604_vm9 = vcmp.le.s32.totalorder %v2233_v31, %v572_v23 }
 0x2d4   : > { %v459_v27 = vsel %vm453_vm3, %v458_v25, %v2198_v11  ;;  %vm603_vm6 = vcmp.le.s32.totalorder %v2233_v31, %v565_v16  ;;  %v2284_v25 = vsel %vm602_vm7, 0.0, %v1910_v21 }
 0x2d5   : > { %460 = vrot.lane.b32.xlu0 %v456_v26, %s1904_s29  ;;  %462 = vrot.lane.b32.xlu1 %v459_v27, %s1904_s29  ;;  %v2282_v22 = vsel %vm603_vm6, 0.0, %v1910_v21 }
 0x2d9   : > { %531 = vrot.lane.b32.xlu0 %v435_v28, %s1904_s29 }
 0x2dd   : > { %529 = vrot.lane.b32.xlu0 %v434_v29, %s1904_s29 }
 0x33f   : > { %v516_v32 = vpop.permute.xlu0 %515  ;;  %v522_v34 = vpop.permute.xlu1 %521 }
 0x340   : > { %v526_v42 = vsel %vm2237_vm4, %v516_v32, %v522_v34 }
 0x341   : > { %v538_v45 = vmul.f32 %v526_v42, %v437_v41 }
 0x343   : > { %v514_v37 = vpop.permute.xlu0 %513  ;;  %v520_v38 = vpop.permute.xlu1 %519 }
 0x344   : > { %v525_v39 = vsel %vm2237_vm4, %v514_v37, %v520_v38 }
 0x345   : > { %v537_v40 = vmul.f32 %v525_v39, %v436_v35 }
 0x347   : > { %v461_v43 = vpop.permute.xlu0 %460  ;;  %541 = vrot.lane.b32.xlu1 %v537_v40, %s1904_s29  ;;  %v463_v46 = vpop.permute.xlu1 %462 }
 0x348   : > { %v464_v44 = vsel %vm453_vm3, %v461_v43, %v2202_v13  ;;  %v465_v47 = vsel %vm453_vm3, %v463_v46, %v2198_v11 }
 0x349   : > { %468 = vrot.lane.b32.xlu0 %v464_v44, %s1906_s13 }
 0x34b   : > { %543 = vrot.lane.b32.xlu1 %v538_v45, %s1904_s29  ;;  %v532_v48 = vpop.permute.xlu0 %531 }
 0x34c   : > { %v536_v53 = vmul.f32 %v2198_v11, %v532_v48 }
 0x34d   : > { %470 = vrot.lane.b32.xlu0 %v465_v47, %s1906_s13 }
 0x34f   : > { %474 = vrot.lane.b32.xlu1 %v464_v44, %s1908_s17  ;;  %v530_v49 = vpop.permute.xlu0 %529 }
 0x350   : > { %v535_v50 = vmul.f32 %v2202_v13, %v530_v49 }
 0x353   : > { %476 = vrot.lane.b32.xlu1 %v465_v47, %s1908_s17 }
 0x3b9   : > { %v542_v51 = vpop.permute.xlu1 %541 }
 0x3ba   : > { %v2254_v52 = vadd.f32 %v542_v51, %v535_v50 }
 0x3bb   : > { %v469_v56 = vpop.permute.xlu0 %468 }
 0x3bc   : > { %618 = vrot.lane.b32.xlu1 %v2254_v52, %s1904_s29 }
 0x3bd   : > { %v544_v54 = vpop.permute.xlu1 %543 }
 0x3be   : > { %v2259_v55 = vadd.f32 %v544_v54, %v536_v53 }
 0x3bf   : > { %v471_v61 = vpop.permute.xlu0 %470 }
 0x3c0   : > { %620 = vrot.lane.b32.xlu0 %v2259_v55, %s1904_s29  ;;  %s1825_s29 = scalar_lea.vmem %s1824_s11, 512 }
 0x3c1   : > { %v475_v57 = vpop.permute.xlu1 %474  ;;  %p1827_p10 = scmp.lt.s32.totalorder %s1825_s29, %s1819_s22 }
 0x3c2   : > { %v480_v58 = vsel %vm2237_vm4, %v469_v56, %v475_v57 }
 0x3c3   : > { %v484_v60 = vmul.f32 %v480_v58, %v436_v35  ;;  %v2295_v35 = vsel %vm604_vm9, 0.0, %v1910_v21  ;;  %p1828_p1 = por %p1827_p10, %p1826_p9 }
 0x3c5   : > { %v477_v62 = vpop.permute.xlu1 %476  ;;  %v486_v63 = vadd.f32 %v484_v60, %v482_v59  ;;  %p1829_p5 = pnand %p1828_p1, %p1822_p8 }
 0x3c6   : > { %v481_v1 = vsel %vm2237_vm4, %v471_v61, %v477_v62 }
 0x3c7   : > { %v485_v3 = vmul.f32 %v481_v1, %v437_v41  ;;  %v488_v4 = vmul.f32 0.25, %v486_v63 }
 0x3c9   : > { %612 = vrot.lane.b32.xlu0 %v488_v4, %s1909_s3  ;;  %1500 = vmatprep.mubr.msk.f32.mxu1 %vm622_vm5, %v488_v4  ;;  %v487_v5 = vadd.f32 %v485_v3, %v483_v2 }
 0x3cb   : > { %v489_v6 = vmul.f32 0.25, %v487_v5 }
 0x3cd   : > { %614 = vrot.lane.b32.xlu1 %v489_v6, %s1909_s3 }
 0x3d1   : > { %758 = vrot.lane.b32.xlu1 %v2198_v11, %s1905_s26 }
 0x42e   : > { %v619_v8 = vpop.permute.xlu1 %618 }
 0x432   : > { %v621_v7 = vpop.permute.xlu0 %620 }
 0x433   : > { %1496 = vmatprep.subr.msk.mxu1 %vm622_vm5, %v621_v7 }
 0x434   : > { %1497 = vmatpush3.xpose.msk.msra.mxu1 %vm622_vm5, %v621_v7 }
 0x435   : > { %1498 = vmatprep.subr.msk.mxu1 %vm622_vm5, %v619_v8 }
 0x438   : > { %1499 = vmatpush3.xpose.msk.msra.mxu1 %vm622_vm5, %v619_v8 }
 0x43b   : > { %v613_v9 = vpop.permute.xlu0 %612  ;;  %1501 = vmatmul.mubr.msk.f32.vlgmr.msra.gmra.mxu1 %vm622_vm5, %v489_v6 }
 0x43c   : > { %1503 = vmatprep.mubr.msk.f32.mxu1 %vm622_vm5, %v613_v9 }
 0x43f   : > { %v615_v10 = vpop.permute.xlu1 %614 }
 0x440   : > { %1504 = vmatmul.mubr.msk.f32.gmra.mxu1 %vm622_vm5, %v615_v10 }
 0x443   : > { %v759_v12 = vpop.permute.xlu1 %758 }
 0x444   : > { %1506 = vmatprep.subr.mxu1 %v759_v12 }
 0x445   : > { %1507 = vmatpush3.msra.mxu1 %v759_v12 }
 0x4fb   : > { %v1502_v24 = vpop.f32.mrf.mxu1 }
 0x4fc   : > { %v707_v26 = vadd.f32 %v1502_v24, %v2282_v22 }
 0x4fd   : > { %v701_v27 = vpop.f32.mrf.mxu1 }
 0x4fe   : > { %v702_v28 = vadd.f32 %v701_v27, %v2284_v25  ;;  %v723_v29 = vsel %vm622_vm5, %v707_v26, -inf }
 0x4ff   : > { %724 = vmax.xlane.f32.xlu1 %v723_v29 }
 0x500   : > { %v1505_v32 = vpop.f32.mrf.mxu1  ;;  %v720_v33 = vsel %vm622_vm5, %v702_v28, -inf }
 0x501   : > { %v717_v34 = vadd.f32 %v1505_v32, %v2290_v30  ;;  %721 = vmax.xlane.f32.xlu0 %v720_v33 }
 0x502   : > { %v711_v36 = vpop.f32.mrf.mxu1 }
 0x503   : > { %v729_v37 = vsel %vm622_vm5, %v717_v34, -inf  ;;  %v712_v38 = vadd.f32 %v711_v36, %v2295_v35 }
 0x505   : > { %730 = vmax.xlane.f32.xlu0 %v729_v37  ;;  %v726_v39 = vsel %vm622_vm5, %v712_v38, -inf }
 0x509   : > { %727 = vmax.xlane.f32.xlu0 %v726_v39 }
 0x510   : > { %890 = vrot.lane.b32.xlu1 %v2259_v55, %s1911_s1 }
 0x514   : > { %888 = vrot.lane.b32.xlu1 %v2254_v52, %s1911_s1 }
 0x518   : > { %882 = vrot.lane.b32.xlu1 %v489_v6, %s1912_s9 }
 0x51c   : > { %886 = vrot.lane.b32.xlu1 %v615_v10, %s1912_s9 }
 0x51f   : > { %756 = vrot.lane.b32.xlu0 %v2202_v13, %s1905_s26 }
 0x523   : > { %880 = vrot.lane.b32.xlu0 %v488_v4, %s1912_s9 }
 0x527   : > { %884 = vrot.lane.b32.xlu0 %v613_v9, %s1912_s9 }
 0x588   : > { %v725_v31 = vpop.xlane.xlu1 %724 }
 0x589   : > { %v733_v40 = vsub.f32 %v707_v26, %v725_v31 }
 0x58a   : > { %v722_v41 = vpop.xlane.xlu0 %721 }
 0x58b   : > { %v732_v42 = vsub.f32 %v702_v28, %v722_v41  ;;  %v738_v43 = vmul.f32 1.442695, %v733_v40 }
 0x58c   : > { %v891_v52 = vpop.permute.xlu1 %890 }
 0x58d   : > { %v736_v44 = vmul.f32 1.442695, %v732_v42 }
 0x58e   : > { %v731_v45 = vpop.xlane.xlu0 %730 }
 0x58f   : > { %1651 = vpow2.f32 %v736_v44  ;;  %v735_v46 = vsub.f32 %v717_v34, %v731_v45 }
 0x590   : > { %1653 = vpow2.f32 %v738_v43  ;;  %v889_v55 = vpop.permute.xlu1 %888 }
 0x591   : > { %v742_v49 = vmul.f32 1.442695, %v735_v46 }
 0x592   : > { %v728_v47 = vpop.xlane.xlu0 %727 }
 0x593   : > { %v734_v48 = vsub.f32 %v712_v38, %v728_v47 }
 0x594   : > { %v883_v59 = vpop.permute.xlu1 %882 }
 0x595   : > { %v740_v50 = vmul.f32 1.442695, %v734_v48 }
 0x596   : > { %v757_v51 = vpop.permute.xlu0 %756 }
 0x597   : > { %1655 = vpow2.f32 %v740_v50  ;;  %1508 = vmatprep.subr.mxu1 %v757_v51 }
 0x598   : > { %1657 = vpow2.f32 %v742_v49  ;;  %1509 = vmatpush3.msra.mxu1 %v757_v51  ;;  %v887_v61 = vpop.permute.xlu1 %886 }
 0x599   : > { %1516 = vmatprep.subr.msk.mxu1 %vm622_vm5, %v891_v52 }
 0x59a   : > { %v881_v57 = vpop.permute.xlu0 %880 }
 0x59c   : > { %v2307_v53 = vpop.eup %1651 }
 0x59d   : > { %v2309_v54 = vpop.eup %1653  ;;  %1510 = vmatprep.mubr.msk.f32.mxu1 %vm622_vm5, %v2307_v53  ;;  %v744_v40 = vsel %vm622_vm5, %v2307_v53, 0.0 }
 0x59e   : > { %1511 = vmatmul.mubr.msk.f32.vlgmr.msra.gmra.mxu1 %vm622_vm5, %v2309_v54  ;;  %v885_v60 = vpop.permute.xlu0 %884  ;;  %v747_v39 = vsel %vm622_vm5, %v2309_v54, 0.0 }
 0x59f   : > { %1517 = vmatpush3.xpose.msk.msra.mxu1 %vm622_vm5, %v891_v52 }
 0x5a0   : > { %1518 = vmatprep.subr.msk.mxu1 %vm622_vm5, %v889_v55 }
 0x5a3   : > { %1519 = vmatpush3.xpose.msk.msra.mxu1 %vm622_vm5, %v889_v55 }
 0x5a4   : > { %v1656_v56 = vpop.eup %1655 }
 0x5a5   : > { %v1658_v58 = vpop.eup %1657  ;;  %1513 = vmatprep.mubr.msk.f32.mxu1 %vm622_vm5, %v1656_v56  ;;  %v750_v17 = vsel %vm622_vm5, %v1656_v56, 0.0 }
 0x5a6   : > { %1514 = vmatmul.mubr.msk.f32.gmra.mxu1 %vm622_vm5, %v1658_v58  ;;  %v753_v18 = vsel %vm622_vm5, %v1658_v58, 0.0 }
 0x5a7   : > { %1520 = vmatprep.mubr.msk.f32.mxu1 %vm622_vm5, %v881_v57 }
 0x5aa   : > { %1521 = vmatmul.mubr.msk.f32.vlgmr.msra.gmra.mxu1 %vm622_vm5, %v883_v59  ;;  %v1647_v59 = vld [vmem:[#allocation8 + $0x18] sm:$0xff]  }
 0x5ab   : > { %1523 = vmatprep.mubr.msk.f32.mxu1 %vm622_vm5, %v885_v60  ;;  %1537 = vmatpush3.bf16.msra.mxu0 %v1647_v59  ;;  %v1648_v60 = vld [vmem:[#allocation8 + $0x10] sm:$0xff]  }
 0x5ac   : > { %1538 = vmatprep.subr.bf16.mxu0 %v1902_v0 }
 0x5ae   : > { %1524 = vmatmul.mubr.msk.f32.gmra.mxu1 %vm622_vm5, %v887_v61 }
 0x5af   : > { %1539 = vmatpush3.bf16.msra.mxu0 %v1648_v60 }
 0x5b0   : > { %1540 = vmatprep.subr.bf16.mxu0 %v1902_v0 }
 0x65e   : > { %v2324_v62 = vpop.f32.mrf.mxu1 }
 0x660   : > { %v2326_v63 = vpop.f32.mrf.mxu1 }
 0x666   : > { %v2328_v1 = vpop.f32.mrf.mxu1 }
 0x668   : > { %v2330_v2 = vpop.f32.mrf.mxu1 }
 0x66a   : > { %v1522_v3 = vpop.f32.mrf.mxu1 }
 0x66b   : > { %v976_v4 = vadd.f32 %v1522_v3, %v2282_v22 }
 0x66c   : > { %v970_v5 = vpop.f32.mrf.mxu1 }
 0x66d   : > { %v971_v6 = vadd.f32 %v970_v5, %v2284_v25  ;;  %v992_v7 = vsel %vm622_vm5, %v976_v4, -inf }
 0x66e   : > { %993 = vmax.xlane.f32.xlu1 %v992_v7  ;;  %v1525_v8 = vpop.f32.mrf.mxu1 }
 0x66f   : > { %v986_v9 = vadd.f32 %v1525_v8, %v2290_v30  ;;  %v989_v10 = vsel %vm622_vm5, %v971_v6, -inf }
 0x670   : > { %990 = vmax.xlane.f32.xlu0 %v989_v10  ;;  %v980_v12 = vpop.f32.mrf.mxu1 }
 0x671   : > { %v981_v14 = vadd.f32 %v980_v12, %v2295_v35  ;;  %v998_v15 = vsel %vm622_vm5, %v986_v9, -inf }
 0x673   : > { %v995_v16 = vsel %vm622_vm5, %v981_v14, -inf }
 0x674   : > { %999 = vmax.xlane.f32.xlu0 %v998_v15 }
 0x678   : > { %996 = vmax.xlane.f32.xlu0 %v995_v16 }
 0x67f   : > { %1027 = vrot.lane.b32.xlu1 %v2198_v11, %s1913_s12 }
 0x68e   : > { %1025 = vrot.lane.b32.xlu0 %v2202_v13, %s1913_s12 }
 0x6a3   : > { %751 = vadd.xlane.f32.xlu1 %v750_v17 }
 0x6ad   : > { %754 = vadd.xlane.f32.xlu0 %v753_v18 }
 0x6f7   : > { %v994_v19 = vpop.xlane.xlu1 %993 }
 0x6f8   : > { %v1002_v20 = vsub.f32 %v976_v4, %v994_v19  ;;  %v1650_v4 = vld [vmem:[#allocation8] sm:$0xff]  }
 0x6f9   : > { %v991_v21 = vpop.xlane.xlu0 %990 }
 0x6fa   : > { %v1007_v22 = vmul.f32 1.442695, %v1002_v20  ;;  %v1001_v23 = vsub.f32 %v971_v6, %v991_v21 }
 0x6fb   : > { %v1028_v24 = vpop.permute.xlu1 %1027 }
 0x6fc   : > { %1659 = vpow2.f32 %v1007_v22  ;;  %v1005_v25 = vmul.f32 1.442695, %v1001_v23  ;;  %1526 = vmatprep.subr.mxu1 %v1028_v24 }
 0x6fd   : > { %1527 = vmatpush3.msra.mxu1 %v1028_v24  ;;  %v1000_v11 = vpop.xlane.xlu0 %999 }
 0x6fe   : > { %1661 = vpow2.f32 %v1005_v25  ;;  %v1004_v26 = vsub.f32 %v986_v9, %v1000_v11 }
 0x700   : > { %v1011_v13 = vmul.f32 1.442695, %v1004_v26 }
 0x701   : > { %v997_v27 = vpop.xlane.xlu0 %996 }
 0x702   : > { %1663 = vpow2.f32 %v1011_v13  ;;  %v1003_v28 = vsub.f32 %v981_v14, %v997_v27 }
 0x704   : > { %v1009_v29 = vmul.f32 1.442695, %v1003_v28 }
 0x705   : > { %v1026_v30 = vpop.permute.xlu0 %1025 }
 0x706   : > { %1665 = vpow2.f32 %v1009_v29  ;;  %1528 = vmatprep.subr.mxu1 %v1026_v30 }
 0x707   : > { %1529 = vmatpush3.msra.mxu1 %v1026_v30 }
 0x709   : > { %v1660_v32 = vpop.eup %1659 }
 0x70a   : > { %v1016_v33 = vsel %vm622_vm5, %v1660_v32, 0.0 }
 0x70b   : > { %v1662_v34 = vpop.eup %1661  ;;  %1017 = vadd.xlane.f32.xlu0 %v1016_v33 }
 0x70c   : > { %1530 = vmatprep.mubr.msk.f32.mxu1 %vm622_vm5, %v1662_v34  ;;  %v1013_v35 = vsel %vm622_vm5, %v1662_v34, 0.0 }
 0x70d   : > { %1014 = vadd.xlane.f32.xlu1 %v1013_v35  ;;  %1531 = vmatmul.mubr.msk.f32.vlgmr.msra.gmra.mxu1 %vm622_vm5, %v1660_v32 }
 0x70f   : > { %v1664_v36 = vpop.eup %1663 }
 0x710   : > { %v1022_v37 = vsel %vm622_vm5, %v1664_v36, 0.0 }
 0x711   : > { %1023 = vadd.xlane.f32.xlu0 %v1022_v37 }
 0x713   : > { %v1666_v38 = vpop.eup %1665 }
 0x714   : > { %1533 = vmatprep.mubr.msk.f32.mxu1 %vm622_vm5, %v1666_v38  ;;  %v1019_v31 = vsel %vm622_vm5, %v1666_v38, 0.0 }
 0x715   : > { %748 = vadd.xlane.f32.xlu0 %v747_v39  ;;  %1020 = vadd.xlane.f32.xlu1 %v1019_v31 }
 0x716   : > { %1534 = vmatmul.mubr.msk.f32.gmra.mxu1 %vm622_vm5, %v1664_v36 }
 0x719   : > { %745 = vadd.xlane.f32.xlu1 %v744_v40 }
 0x72c   : > { %v752_v41 = vpop.xlane.xlu1 %751 }
 0x72d   : > { %1667 = vrcp.f32 %v752_v41 }
 0x736   : > { %v755_v42 = vpop.xlane.xlu0 %754 }
 0x737   : > { %1669 = vrcp.f32 %v755_v42 }
 0x73a   : > { %v1668_v43 = vpop.eup %1667 }
 0x73b   : > { %v864_v44 = vmul.f32 %v1668_v43, %v2330_v2 }
 0x73d   : > { %871 = vrot.lane.b32.xlu1 %v864_v44, %s1913_s12 }
 0x744   : > { %v1670_v45 = vpop.eup %1669 }
 0x745   : > { %v866_v46 = vmul.f32 %v1670_v45, %v2328_v1  ;;  %v1649_v1 = vld [vmem:[#allocation8 + $0x8] sm:$0xff]  }
 0x746   : > { %1541 = vmatpush3.bf16.msra.mxu0 %v1649_v1 }
 0x747   : > { %873 = vrot.lane.b32.xlu0 %v866_v46, %s1913_s12  ;;  %1542 = vmatprep.subr.bf16.mxu0 %v1902_v0 }
 0x74a   : > { %1543 = vmatpush3.bf16.msra.mxu0 %v1650_v4 }
 0x794   : > { %v1018_v47 = vpop.xlane.xlu0 %1017 }
 0x796   : > { %v1015_v48 = vpop.xlane.xlu1 %1014 }
 0x79a   : > { %v1024_v49 = vpop.xlane.xlu0 %1023 }
 0x79e   : > { %v1021_v50 = vpop.xlane.xlu1 %1020  ;;  %v749_v51 = vpop.xlane.xlu0 %748 }
 0x79f   : > { %1671 = vrcp.f32 %v749_v51 }
 0x7a2   : > { %v746_v52 = vpop.xlane.xlu1 %745 }
 0x7a3   : > { %1673 = vrcp.f32 %v746_v52 }
 0x7a4   : > { %1675 = vrcp.f32 %v1018_v47 }
 0x7a5   : > { %1677 = vrcp.f32 %v1015_v48 }
 0x7a6   : > { %1679 = vrcp.f32 %v1024_v49 }
 0x7a7   : > { %1681 = vrcp.f32 %v1021_v50 }
 0x7ac   : > { %v1672_v53 = vpop.eup %1671 }
 0x7ad   : > { %v862_v54 = vmul.f32 %v1672_v53, %v2324_v62 }
 0x7af   : > { %868 = vst.msk [vmem:[#allocation2 + $0x8] sm:$0xff] %vm622_vm5, %v862_v54  ;;  %v872_v57 = vpop.permute.xlu1 %871 }
 0x7b0   : > { %v1674_v55 = vpop.eup %1673 }
 0x7b1   : > { %v860_v56 = vmul.f32 %v1674_v55, %v2326_v63  ;;  %v1676_v61 = vpop.eup %1675 }
 0x7b2   : > { %v1678_v3 = vpop.eup %1677 }
 0x7b3   : > { %867 = vst.msk [vmem:[#allocation2] sm:$0xff] %vm622_vm5, %v860_v56  ;;  %v1680_v6 = vpop.eup %1679 }
 0x7b4   : > { %878 = vst.msk [vmem:[#allocation2] sm:$0xff] %vm877_vm10, %v872_v57  ;;  %v1682_v9 = vpop.eup %1681 }
 0x7b9   : > { %v874_v58 = vpop.permute.xlu0 %873 }
 0x7ba   : > { %879 = vst.msk [vmem:[#allocation2 + $0x8] sm:$0xff] %vm877_vm10, %v874_v58 }
 0x7cd   : > { %v1532_v62 = vpop.f32.mrf.mxu1 }
 0x7ce   : > { %v1131_v63 = vmul.f32 %v1676_v61, %v1532_v62 }
 0x7cf   : > { %v1109_v2 = vpop.f32.mrf.mxu1 }
 0x7d0   : > { %1140 = vrot.lane.b32.xlu1 %v1131_v63, %s1905_s26  ;;  %v1129_v5 = vmul.f32 %v1678_v3, %v1109_v2 }
 0x7d4   : > { %1138 = vrot.lane.b32.xlu1 %v1129_v5, %s1905_s26 }
 0x7d6   : > { %v1535_v7 = vpop.f32.mrf.mxu1 }
 0x7d7   : > { %v1135_v8 = vmul.f32 %v1680_v6, %v1535_v7 }
 0x7d8   : > { %v1119_v10 = vpop.f32.mrf.mxu1 }
 0x7d9   : > { %v1133_v12 = vmul.f32 %v1682_v9, %v1119_v10  ;;  %1151 = vrot.lane.b32.xlu1 %v1135_v8, %s1911_s1 }
 0x7db   : > { %1149 = vrot.lane.b32.xlu0 %v1133_v12, %s1911_s1 }
 0x842   : > { %v1141_v14 = vpop.permute.xlu1 %1140 }
 0x843   : > { %1146 = vst.msk [vmem:[#allocation2 + $0x8] sm:$0xff] %vm1144_vm11, %v1141_v14 }
 0x846   : > { %v1139_v15 = vpop.permute.xlu1 %1138 }
 0x847   : > { %1145 = vst.msk [vmem:[#allocation2] sm:$0xff] %vm1144_vm11, %v1139_v15 }
 0x84b   : > { %v1152_v0 = vpop.permute.xlu1 %1151 }
 0x84c   : > { %1157 = vst.msk [vmem:[#allocation2 + $0x8] sm:$0xff] %vm1155_vm12, %v1152_v0 }
 0x84d   : > { %v1150_v16 = vpop.permute.xlu0 %1149 }
 0x84e   : > { %1156 = vst.msk [vmem:[#allocation2] sm:$0xff] %vm1155_vm12, %v1150_v16 }
 0x853   : > { %v1159_v18 = vld [vmem:[#allocation2 + $0x8] sm:$0xff] }
 0x855   : > { %v1158_v17 = vld [vmem:[#allocation2] sm:$0xff] }
 0x856   : > { %v1160_v19 = vpack.c.bf16 %v1159_v18, %v1158_v17 }
 0x858   : > { %1545 = vmatmul.mubr.msk.bf16.vlgmr.msra.gmra.mxu0 %vm385_vm1, %v1160_v19 }
 0x918   : > { %v1230_v20 = vpop.f32.mrf.mxu0 }
 0x919   : > { %1237 = vst.msk [vmem:[%s348_s23] sm:$0xff] %vm385_vm1, %v1230_v20 }
 0x91a   : > { %v1546_v21 = vpop.f32.mrf.mxu0 }
 0x91c   : > { %v1233_v22 = vpop.f32.mrf.mxu0 }
 0x91d   : > { %1238 = vst.msk [vmem:[%s348_s23 + $0x8] sm:$0xff] %vm385_vm1, %v1233_v22 }
 0x91e   : > { %v1547_v23 = vpop.f32.mrf.mxu0 }
 0x91f   : > { %1832 = shalt.err (!%p1829_p5)
}
 0x920   : > { %s1833_s26 = scalar_lea.hbm %s2382_s7, 256  ;;  %s1837_s10 = scalar_lea.hbm %s2431_s5, 512 }
 0x921   : > { %p1834_p12 = scmp.ne.s32.totalorder %s2382_s7, %s1833_s26  ;;  %p1838_p6 = scmp.lt.s32.totalorder %s2382_s7, %s2431_s5 }
 0x922   : > { %p1839_p4 = scmp.lt.s32.totalorder %s1837_s10, %s1833_s26 }
 0x923   : > { %p1835_p0 = pnand %p1834_p12, %p2474_p7 }
 0x924   : > { %p1840_p13 = por %p1839_p4, %p1838_p6 }
 0x925   : > { %p1836_p11 = pneg %p1835_p0 }
 0x927   : > { %p1841_p2 = pnand %p1840_p13, %p1836_p11 }
 0x929   : > { %1844 = shalt.err (!%p1841_p2)
}
 0x92a   : > { %s1915_s1 = smov 128   ;;  %s1916_s9 = smov 8  }
 0x92b   : > { %1562 = dma.vmem_to_hbm [thread:$0]  (%p2474_p7), %s2377_s8, 256, %s2382_s7, %s1240_s14, %s1915_s1, %s1915_s1, %s1916_s9  }
 0x92c PF: > { %s1268_s12 = sand.u32 1, %s1879_s18   ;;  %p2475_p3 = scmp.ne.s32.totalorder %s2453_s6, 0 }
 0x92d   : > { %p2476_p8 = scmp.ge.s32.totalorder %s1891_s21, 2  ;;  %s1269_s23 = scalar_lea.sflag [#allocation5], %s1268_s12 }
 0x92f   : > { %p1582_p9 = pnand %p2476_p8, %p2475_p3 }
 0x931   : > { %p1583_p10 = pneg %p1582_p9 }
 0x933   : > { %1874 = dma.done.wait (%p1583_p10), %s1269_s23, 256  }
 0x934   : > { %1876 = vsyncadd (%p1583_p10), %s1269_s23, 4294967040  ;;  %s2477_s16 = sld [smem:[#allocation17_spill]]  ;;  %p22_p1 = scmp.ge.s32.totalorder %s1972_s24, 4  }
 0x935   : > { %s2478_s18 = smov %s1883_s19  ;;  %s2479_s19 = smov %s1887_s20 }
 0x936   : > { %s2481_s21 = smov %s1972_s24  ;;  %24 = sbr.rel (!%p22_p1) target bundleno = 12 (0xc), region = 117 }
 0x93a   : > { %s2480_s20 = smov %s2477_s16 }
 0x93b   :  { %1274 = vsyncpa [#allocation4], 1 }
 0x93c   :  { %1276 = vsyncpa [#allocation4 + $0x1], 1 }
 0x93d   :  { %1277 = vsyncpa [#allocation7], 1 }
 0x93e   :  { %1278 = vsyncpa [#allocation10], 1 }
 0x93f   :  { %1280 = vsyncpa [#allocation10 + $0x1], 1 }
 0x940   :  { %1281 = vsyncpa [#allocation5], 1 }
 0x941   :  { %1283 = vsyncpa [#allocation5 + $0x1], 1 }

</bundles_post_ra>
